<compile_context>
chip_gen: v6e
topology: v6e:2x2x1
jax: 0.10.0
libtpu: 0.0.40
codegen_flags: <defaults>
</compile_context>

<pallas_src>
import jax
import jax.numpy as jnp
from jax.experimental import pallas as pl
from jax.experimental.pallas import tpu as pltpu


def _round_up(x, m):
    return (x + m - 1) // m * m


def _yolo_head_kernel(x_ref, w_ref, b_ref, c2_ref, c1_ref, mx_ref, my_ref,
                      c0xy_ref, logits_ref, z_ref):
    # 1x1 conv over channels, lane-dense: (OC, C) @ (C, tn) + bias
    logits = jnp.dot(w_ref[...], x_ref[...],
                     preferred_element_type=jnp.float32) + b_ref[...]
    logits_ref[...] = logits                       # raw head output (torch x[i])
    s = jax.nn.sigmoid(logits)
    # constant term: (grid_x-0.5)*stride on k==0 rows, (grid_y-0.5)*stride on k==1
    c0xy = c0xy_ref[...]                           # (2, tn)
    c0 = mx_ref[...] * c0xy[0:1, :] + my_ref[...] * c0xy[1:2, :]
    # box decode as a Horner-form quadratic in the sigmoid output
    z_ref[...] = s * (c2_ref[...] * s + c1_ref[...]) + c0


def yolo_head_level(x_nchw, weight, bias, anchors_i, stride_i, nc, *,
                    tn_target=1024):
    """One detection level of YOLOHead (eval mode)."""
    B, C, H, W = x_nchw.shape
    na = anchors_i.shape[0]
    no = nc + 5
    OC = na * no
    N = B * H * W
    stride_i = float(stride_i)

    # ---- glue: layout only -------------------------------------------------
    # (B,C,H,W) -> (C, B*H*W); only the small (B,C) axes are swapped.
    x_cn = jnp.transpose(x_nchw, (1, 0, 2, 3)).reshape(C, N).astype(jnp.bfloat16)
    w_oc = weight.reshape(OC, C).astype(jnp.bfloat16)
    b_col = bias.reshape(OC, 1).astype(jnp.float32)

    k = jnp.arange(no, dtype=jnp.float32)
    # linear coefficient per (a,k): 2*stride for xy, 0 for wh, 1 for conf/cls
    c1 = jnp.where(k < 2, 2.0 * stride_i, jnp.where(k < 4, 0.0, 1.0))
    c1 = jnp.broadcast_to(c1[None, :], (na, no)).reshape(OC, 1)
    # quadratic coefficient per (a,k): 4*anchor*stride for wh, else 0
    # (anchor_grid = anchors[i] * stride[i], exactly as in the torch module)
    c2 = jnp.zeros((na, no), jnp.float32)
    c2 = c2.at[:, 2].set(4.0 * anchors_i[:, 0] * stride_i)
    c2 = c2.at[:, 3].set(4.0 * anchors_i[:, 1] * stride_i)
    c2 = c2.reshape(OC, 1)
    # row selectors for the xy constant term
    mx = jnp.broadcast_to((k == 0).astype(jnp.float32)[None, :],
                          (na, no)).reshape(OC, 1)
    my = jnp.broadcast_to((k == 1).astype(jnp.float32)[None, :],
                          (na, no)).reshape(OC, 1)

    # per-pixel xy constants, only a (2, N) stream (not (N, OC))
    xv = (jnp.arange(W, dtype=jnp.float32) - 0.5) * stride_i
    yv = (jnp.arange(H, dtype=jnp.float32) - 0.5) * stride_i
    gx = jnp.broadcast_to(xv[None, None, :], (B, H, W)).reshape(1, N)
    gy = jnp.broadcast_to(yv[None, :, None], (B, H, W)).reshape(1, N)
    c0xy = jnp.concatenate([gx, gy], axis=0)

    # ---- lane tiling --------------------------------------------------------
    tn = min(tn_target, _round_up(N, 128))
    n_pad = _round_up(N, tn)
    if n_pad != N:
        x_cn = jnp.pad(x_cn, ((0, 0), (0, n_pad - N)))
        c0xy = jnp.pad(c0xy, ((0, 0), (0, n_pad - N)))
    grid = (n_pad // tn,)

    cost = pl.CostEstimate(
        flops=2 * C * OC * n_pad + 6 * OC * n_pad,
        transcendentals=OC * n_pad,
        bytes_accessed=(C * n_pad * 2 + OC * C * 2 + 2 * n_pad * 4
                        + 2 * OC * n_pad * 4 + 5 * OC * 4))

    logits_cn, z_cn = pl.pallas_call(
        _yolo_head_kernel,
        out_shape=(jax.ShapeDtypeStruct((OC, n_pad), jnp.float32),
                   jax.ShapeDtypeStruct((OC, n_pad), jnp.float32)),
        grid_spec=pltpu.PrefetchScalarGridSpec(
            num_scalar_prefetch=0,
            grid=grid,
            in_specs=[
                pl.BlockSpec((C, tn), lambda i: (0, i)),   # activations (bf16)
                pl.BlockSpec((OC, C), lambda i: (0, 0)),   # conv weight (bf16)
                pl.BlockSpec((OC, 1), lambda i: (0, 0)),   # bias
                pl.BlockSpec((OC, 1), lambda i: (0, 0)),   # C2
                pl.BlockSpec((OC, 1), lambda i: (0, 0)),   # C1
                pl.BlockSpec((OC, 1), lambda i: (0, 0)),   # x-row selector
                pl.BlockSpec((OC, 1), lambda i: (0, 0)),   # y-row selector
                pl.BlockSpec((2, tn), lambda i: (0, i)),   # per-pixel xy const
            ],
            out_specs=[
                pl.BlockSpec((OC, tn), lambda i: (0, i)),
                pl.BlockSpec((OC, tn), lambda i: (0, i)),
            ],
        ),
        compiler_params=pltpu.CompilerParams(
            dimension_semantics=("parallel",),
            # tiny footprint (a few MiB even at tn=1024); 32 MiB is safe on
            # v5e/v6e (128 MiB physical) and on v7x (64 MiB physical).
            vmem_limit_bytes=32 * 1024 * 1024),
        cost_estimate=cost,
    )(x_cn, w_oc, b_col, c2, c1, mx, my, c0xy)

    # drop column padding and map back to torch's axis conventions
    logits_cn = logits_cn[:, :N]
    z_cn = z_cn[:, :N]
    # raw head output: (B, na, H, W, no)   (torch: view + permute(0,1,3,4,2))
    logits_5d = jnp.transpose(logits_cn.reshape(na, no, B, H, W),
                              (2, 0, 3, 4, 1))
    # decoded: (B, na*H*W, no)             (torch: y.view(B, -1, no))
    z = jnp.transpose(z_cn.reshape(na, no, B, H, W),
                      (2, 0, 3, 4, 1)).reshape(B, na * H * W, no)
    return logits_5d, z


def yolo_head_forward(xs, weights, biases, anchors, strides, nc):
    """Eval-mode forward: returns (cat(z, axis=1), [x_i reshaped])."""
    # TODO(synk): training-mode branch simply returns x_out; the stateful
    # grid/anchor_grid caching of the torch module has no Pallas equivalent and
    # the (tiny) grid constants are recomputed per call.
    # TODO(synk): the three levels are still separate pallas_calls; fusing them
    # into one call (or running the deepest tiny level in plain XLA) would cut
    # launch/prologue overhead further.
    x_out, z_out = [], []
    for i in range(len(xs)):
        logits_5d, z = yolo_head_level(
            xs[i], weights[i], biases[i], anchors[i], strides[i], nc)
        x_out.append(logits_5d)
        z_out.append(z)
    return jnp.concatenate(z_out, axis=1), x_out


def _reference_level(x_nchw, weight, bias, anchors_i, stride_i, nc):
    """Plain-JAX reference mirroring the torch module (same bf16-quantized inputs)."""
    B, C, H, W = x_nchw.shape
    na = anchors_i.shape[0]
    no = nc + 5
    OC = na * no
    xq = x_nchw.astype(jnp.bfloat16).astype(jnp.float32)
    wq = weight.reshape(OC, C).astype(jnp.bfloat16).astype(jnp.float32)
    logits = jnp.einsum('bchw,oc->bohw', xq, wq) + bias[None, :, None, None]
    x5 = jnp.transpose(logits.reshape(B, na, no, H, W), (0, 1, 3, 4, 2))
    y = jax.nn.sigmoid(x5)
    yv, xv = jnp.meshgrid(jnp.arange(H, dtype=jnp.float32),
                          jnp.arange(W, dtype=jnp.float32), indexing='ij')
    grid = jnp.stack([xv, yv], axis=-1)[None, None]            # (1,1,H,W,2)
    anchor_grid = (anchors_i * stride_i).reshape(1, na, 1, 1, 2)
    xy = (y[..., 0:2] * 2 - 0.5 + grid) * stride_i
    wh = (y[..., 2:4] * 2) ** 2 * anchor_grid
    z = jnp.concatenate([xy, wh, y[..., 4:]], axis=-1).reshape(B, na * H * W, no)
    return x5, z


if __name__ == "__main__":
    nc = 3                           # small class count -> no = 8
    in_channels = (16, 32, 64)
    spatials = (8, 4, 2)             # per-level feature-map sizes
    strides = (8.0, 16.0, 32.0)      # YOLOHead.stride (set externally in torch)
    B = 2
    nl = len(in_channels)

    anchor_list = [10, 13, 16, 30, 62, 45, 59, 119, 156, 198, 373, 326]
    na = len(anchor_list) // 2 // nl          # == 2, exactly as in the module
    no = nc + 5
    anchors = jnp.array(anchor_list, dtype=jnp.float32).reshape(nl, na, 2)

    key = jax.random.PRNGKey(0)
    xs, weights, biases = [], [], []
    for cin, hw in zip(in_channels, spatials):
        kx, kw, kb, key = jax.random.split(key, 4)
        xs.append(jax.random.normal(kx, (B, cin, hw, hw), jnp.float32))
        weights.append(
            0.1 * jax.random.normal(kw, (na * no, cin, 1, 1), jnp.float32))
        biases.append(0.1 * jax.random.normal(kb, (na * no,), jnp.float32))

    z_cat, x_raw = yolo_head_forward(xs, weights, biases, anchors, strides, nc)
    jax.block_until_ready(z_cat)
    for t in x_raw:
        jax.block_until_ready(t)

    # shape sanity
    assert z_cat.shape == (B, na * sum(h * h for h in spatials), no)
    assert x_raw[0].shape == (B, na, spatials[0], spatials[0], no)

    # numerical check against the plain-JAX reference
    z_refs = []
    for i in range(nl):
        xr, zr = _reference_level(xs[i], weights[i], biases[i],
                                  anchors[i], strides[i], nc)
        z_refs.append(zr)
        assert jnp.allclose(x_raw[i], xr, rtol=5e-3, atol=5e-2), \
            f"level {i} logits mismatch"
    z_ref = jnp.concatenate(z_refs, axis=1)
    assert jnp.allclose(z_cat, z_ref, rtol=5e-3, atol=5e-2), \
        f"decoded mismatch, max abs err {float(jnp.max(jnp.abs(z_cat - z_ref)))}"

    print("KERNEL_OK")
</pallas_src>

<mosaic_0001>
module attributes {stable_mosaic.version = 11 : i64} {
  func.func @_yolo_head_kernel(%arg0: i32, %arg1: memref<16x128xbf16, #tpu.memory_space<vmem>>, %arg2: memref<16x16xbf16, #tpu.memory_space<vmem>>, %arg3: memref<16x1xf32, #tpu.memory_space<vmem>>, %arg4: memref<16x1xf32, #tpu.memory_space<vmem>>, %arg5: memref<16x1xf32, #tpu.memory_space<vmem>>, %arg6: memref<16x1xf32, #tpu.memory_space<vmem>>, %arg7: memref<16x1xf32, #tpu.memory_space<vmem>>, %arg8: memref<2x128xf32, #tpu.memory_space<vmem>>, %arg9: memref<16x128xf32, #tpu.memory_space<vmem>>, %arg10: memref<16x128xf32, #tpu.memory_space<vmem>>) attributes {dimension_semantics = [#tpu.dimension_semantics<parallel>], iteration_bounds = array<i64: 1>, scalar_prefetch = 0 : i64, scratch_operands = 0 : i64, tpu.core_type = #tpu.core_type<tc>, window_params = [{transform_indices = @transform_0, window_bounds = array<i64: 16, 128>}, {pipeline_mode = #tpu.pipeline_mode<synchronous>, transform_indices = @transform_1, window_bounds = array<i64: 16, 16>}, {pipeline_mode = #tpu.pipeline_mode<synchronous>, transform_indices = @transform_2, window_bounds = array<i64: 16, 1>}, {pipeline_mode = #tpu.pipeline_mode<synchronous>, transform_indices = @transform_3, window_bounds = array<i64: 16, 1>}, {pipeline_mode = #tpu.pipeline_mode<synchronous>, transform_indices = @transform_4, window_bounds = array<i64: 16, 1>}, {pipeline_mode = #tpu.pipeline_mode<synchronous>, transform_indices = @transform_5, window_bounds = array<i64: 16, 1>}, {pipeline_mode = #tpu.pipeline_mode<synchronous>, transform_indices = @transform_6, window_bounds = array<i64: 16, 1>}, {transform_indices = @transform_7, window_bounds = array<i64: 2, 128>}, {transform_indices = @transform_8, window_bounds = array<i64: 16, 128>}, {transform_indices = @transform_9, window_bounds = array<i64: 16, 128>}]} {
    %c0 = arith.constant 0 : index
    %c0_0 = arith.constant 0 : index
    %0 = vector.load %arg2[%c0, %c0_0] : memref<16x16xbf16, #tpu.memory_space<vmem>>, vector<16x16xbf16>
    %c0_1 = arith.constant 0 : index
    %c0_2 = arith.constant 0 : index
    %1 = vector.load %arg1[%c0_1, %c0_2] : memref<16x128xbf16, #tpu.memory_space<vmem>>, vector<16x128xbf16>
    %cst = arith.constant dense<0.000000e+00> : vector<16x128xf32>
    %2 = tpu.matmul %0, %1, %cst {dimension_numbers = #tpu.dot_dimension_numbers<[1], [0], [0], [1], [0, 0, 1, 1], [], []>} : vector<16x16xbf16>, vector<16x128xbf16>, vector<16x128xf32> -> vector<16x128xf32>
    %c0_3 = arith.constant 0 : index
    %c0_4 = arith.constant 0 : index
    %3 = vector.load %arg3[%c0_3, %c0_4] : memref<16x1xf32, #tpu.memory_space<vmem>>, vector<16x1xf32>
    %4 = vector.broadcast %3 : vector<16x1xf32> to vector<16x128xf32>
    %5 = arith.addf %2, %4 : vector<16x128xf32>
    %c0_5 = arith.constant 0 : index
    %c0_6 = arith.constant 0 : index
    %6 = vector.load %arg9[%c0_5, %c0_6] : memref<16x128xf32, #tpu.memory_space<vmem>>, vector<16x128xf32>
    tpu.vector_store %arg9[%c0_5, %c0_6], %5 {strides = array<i32>} : memref<16x128xf32, #tpu.memory_space<vmem>>, vector<16x128xf32>,
    %7 = arith.negf %5 : vector<16x128xf32>
    %8 = math.exp %7 : vector<16x128xf32>
    %cst_7 = arith.constant 1.000000e+00 : f32
    %9 = vector.broadcast %cst_7 : f32 to vector<16x128xf32>
    %10 = arith.addf %9, %8 : vector<16x128xf32>
    %11 = arith.divf %9, %10 : vector<16x128xf32>
    %c0_8 = arith.constant 0 : index
    %c0_9 = arith.constant 0 : index
    %12 = vector.load %arg8[%c0_8, %c0_9] : memref<2x128xf32, #tpu.memory_space<vmem>>, vector<2x128xf32>
    %c0_10 = arith.constant 0 : index
    %c0_11 = arith.constant 0 : index
    %13 = vector.load %arg6[%c0_10, %c0_11] : memref<16x1xf32, #tpu.memory_space<vmem>>, vector<16x1xf32>
    %14 = vector.extract_strided_slice %12 {offsets = [0, 0], sizes = [1, 128], strides = [1, 1]} : vector<2x128xf32> to vector<1x128xf32>
    %15 = vector.broadcast %13 : vector<16x1xf32> to vector<16x128xf32>
    %16 = vector.broadcast %14 : vector<1x128xf32> to vector<16x128xf32>
    %17 = arith.mulf %15, %16 : vector<16x128xf32>
    %c0_12 = arith.constant 0 : index
    %c0_13 = arith.constant 0 : index
    %18 = vector.load %arg7[%c0_12, %c0_13] : memref<16x1xf32, #tpu.memory_space<vmem>>, vector<16x1xf32>
    %19 = vector.extract_strided_slice %12 {offsets = [1, 0], sizes = [1, 128], strides = [1, 1]} : vector<2x128xf32> to vector<1x128xf32>
    %20 = vector.broadcast %18 : vector<16x1xf32> to vector<16x128xf32>
    %21 = vector.broadcast %19 : vector<1x128xf32> to vector<16x128xf32>
    %22 = arith.mulf %20, %21 : vector<16x128xf32>
    %23 = arith.addf %17, %22 : vector<16x128xf32>
    %c0_14 = arith.constant 0 : index
    %c0_15 = arith.constant 0 : index
    %24 = vector.load %arg4[%c0_14, %c0_15] : memref<16x1xf32, #tpu.memory_space<vmem>>, vector<16x1xf32>
    %25 = vector.broadcast %24 : vector<16x1xf32> to vector<16x128xf32>
    %26 = arith.mulf %25, %11 : vector<16x128xf32>
    %c0_16 = arith.constant 0 : index
    %c0_17 = arith.constant 0 : index
    %27 = vector.load %arg5[%c0_16, %c0_17] : memref<16x1xf32, #tpu.memory_space<vmem>>, vector<16x1xf32>
    %28 = vector.broadcast %27 : vector<16x1xf32> to vector<16x128xf32>
    %29 = arith.addf %26, %28 : vector<16x128xf32>
    %30 = arith.mulf %11, %29 : vector<16x128xf32>
    %31 = arith.addf %30, %23 : vector<16x128xf32>
    %c0_18 = arith.constant 0 : index
    %c0_19 = arith.constant 0 : index
    %32 = vector.load %arg10[%c0_18, %c0_19] : memref<16x128xf32, #tpu.memory_space<vmem>>, vector<16x128xf32>
    tpu.vector_store %arg10[%c0_18, %c0_19], %31 {strides = array<i32>} : memref<16x128xf32, #tpu.memory_space<vmem>>, vector<16x128xf32>,
    return
  }
  func.func @transform_0(%arg0: i32) -> (i32, i32) {
    %c0_i32 = arith.constant 0 : i32
    %c0_i32_0 = arith.constant 0 : i32
    return %c0_i32, %arg0 : i32, i32
  }
  func.func @transform_1(%arg0: i32) -> (i32, i32) {
    %c0_i32 = arith.constant 0 : i32
    %c0_i32_0 = arith.constant 0 : i32
    %c0_i32_1 = arith.constant 0 : i32
    return %c0_i32, %c0_i32_0 : i32, i32
  }
  func.func @transform_2(%arg0: i32) -> (i32, i32) {
    %c0_i32 = arith.constant 0 : i32
    %c0_i32_0 = arith.constant 0 : i32
    %c0_i32_1 = arith.constant 0 : i32
    return %c0_i32, %c0_i32_0 : i32, i32
  }
  func.func @transform_3(%arg0: i32) -> (i32, i32) {
    %c0_i32 = arith.constant 0 : i32
    %c0_i32_0 = arith.constant 0 : i32
    %c0_i32_1 = arith.constant 0 : i32
    return %c0_i32, %c0_i32_0 : i32, i32
  }
  func.func @transform_4(%arg0: i32) -> (i32, i32) {
    %c0_i32 = arith.constant 0 : i32
    %c0_i32_0 = arith.constant 0 : i32
    %c0_i32_1 = arith.constant 0 : i32
    return %c0_i32, %c0_i32_0 : i32, i32
  }
  func.func @transform_5(%arg0: i32) -> (i32, i32) {
    %c0_i32 = arith.constant 0 : i32
    %c0_i32_0 = arith.constant 0 : i32
    %c0_i32_1 = arith.constant 0 : i32
    return %c0_i32, %c0_i32_0 : i32, i32
  }
  func.func @transform_6(%arg0: i32) -> (i32, i32) {
    %c0_i32 = arith.constant 0 : i32
    %c0_i32_0 = arith.constant 0 : i32
    %c0_i32_1 = arith.constant 0 : i32
    return %c0_i32, %c0_i32_0 : i32, i32
  }
  func.func @transform_7(%arg0: i32) -> (i32, i32) {
    %c0_i32 = arith.constant 0 : i32
    %c0_i32_0 = arith.constant 0 : i32
    return %c0_i32, %arg0 : i32, i32
  }
  func.func @transform_8(%arg0: i32) -> (i32, i32) {
    %c0_i32 = arith.constant 0 : i32
    %c0_i32_0 = arith.constant 0 : i32
    return %c0_i32, %arg0 : i32, i32
  }
  func.func @transform_9(%arg0: i32) -> (i32, i32) {
    %c0_i32 = arith.constant 0 : i32
    %c0_i32_0 = arith.constant 0 : i32
    return %c0_i32, %arg0 : i32, i32
  }
}

</mosaic_0001>

<bundles_post_ra>
// kernel: tpu_custom_call.1
= control target key start
LH: loop header
LB: loop body
LE: loop exit
PB: predicated region body
PF: predicated region fallthrough
CT: control target
= control target key end

     0   :  { %15 = vsyncpa [#allocation3], 0  ;;  %v301_v1 = vmov 0.0   ;;  %vm302_vm0 = vmmov 0   ;;  %vm61_vm1 = vcmask 130048   ;;  %v303_v4 = vmov 0   ;;  %s409_s0 = inlined_call_operand.vmem [shape: bf16[16,128], index: 0, kind: input, shape index: {}]   ;;  %s410_s1 = inlined_call_operand.vmem [shape: bf16[16,16], index: 1, kind: input, shape index: {}]   ;;  %s411_s2 = inlined_call_operand.vmem [shape: f32[16,1], index: 2, kind: input, shape index: {}]   ;;  %s412_s3 = inlined_call_operand.vmem [shape: f32[16,1], index: 3, kind: input, shape index: {}]   ;;  %s413_s4 = inlined_call_operand.vmem [shape: f32[16,1], index: 4, kind: input, shape index: {}]   ;;  %s414_s5 = inlined_call_operand.vmem [shape: f32[16,1], index: 5, kind: input, shape index: {}]   ;;  %s415_s6 = inlined_call_operand.vmem [shape: f32[16,1], index: 6, kind: input, shape index: {}]   ;;  %s416_s7 = inlined_call_operand.vmem [shape: f32[2,128], index: 7, kind: input, shape index: {}]   ;;  %s417_s8 = inlined_call_operand.hbm [shape: f32[16,128], index: 8, kind: output, shape index: {0}]   ;;  %s418_s9 = inlined_call_operand.hbm [shape: f32[16,128], index: 9, kind: output, shape index: {1}]  }
   0x1   :  { %v247_v0 = vld [vmem:[%s409_s0] sm:$0xff]   ;;  %232 = vmatprep.subr.bf16.mxu0 %v301_v1  ;;  %234 = vmatprep.mubr.msk.bf16.mxu0 %vm302_vm0, %v301_v1  ;;  %v39_v6 = vld [vmem:[%s411_s2 + $0x8] sm:$0xff] }
   0x2   :  { %v248_v2 = vld [vmem:[%s410_s1] sm:$0xff]   ;;  %233 = vmatpush3.bf16.msra.mxu0 %v247_v0  ;;  %245 = vset.pattern.permute.xlu0 %v303_v4  ;;  %v160_v7 = vld [vmem:[%s412_s3 + $0x8] sm:$0xff] }
   0x3   :  { %v38_v3 = vld [vmem:[%s411_s2] sm:$0xff]  ;;  %246 = vset.pattern.permute.xlu1 %v303_v4 }
   0x4   :  { %v159_v5 = vld [vmem:[%s412_s3] sm:$0xff]  ;;  %42 = vperm.xlu0 %245, %v38_v3  }
   0x5   :  { %163 = vperm.xlu1 %246, %v159_v5   ;;  %235 = vmatmul.mubr.msk.bf16.vlgmr.msra.gmra.mxu0 %vm61_vm1, %v248_v2 }
   0x6   :  { %16 = vsyncpa [#allocation5], 0  ;;  %v121_v8 = vld [vmem:[%s414_s5] sm:$0xff]  ;;  %v122_v9 = vld [vmem:[%s414_s5 + $0x8] sm:$0xff]  ;;  %s304_s5 = smov [#allocation2]  }
   0x7   :  { %v139_v10 = vld [vmem:[%s415_s6] sm:$0xff]  ;;  %v140_v11 = vld [vmem:[%s415_s6 + $0x8] sm:$0xff]  ;;  %s198_s29 = sshll.u32 %s304_s5, 4  ;;  %s199_s29 = int_to_ptr.vmem [resolvable:$true] %s198_s29 }
   0x8   :  { %47 = vperm.xlu0 %245, %v39_v6   ;;  %v173_v12 = vld [vmem:[%s413_s4] sm:$0xff]  ;;  %v174_v13 = vld [vmem:[%s413_s4 + $0x8] sm:$0xff]  ;;  %s257_s6 = scalar_lea.vmem %s199_s29, 256  ;;  %p262_p1 = scmp.lt.s32.totalorder %s199_s29, %s199_s29 }
   0x9   :  { %168 = vperm.xlu1 %246, %v160_v7   ;;  %p258_p0 = scmp.ne.s32.totalorder %s199_s29, %s257_s6  ;;  %p263_p2 = scmp.lt.s32.totalorder %s257_s6, %s257_s6 }
   0xb   :  { %p264_p3 = por %p263_p2, %p262_p1 }
   0xc   :  { %125 = vperm.xlu0 %245, %v121_v8  }
   0xd   :  { %130 = vperm.xlu1 %246, %v122_v9   ;;  %p265_p4 = pnand %p264_p3, %p258_p0 }
  0x10   :  { %143 = vperm.xlu0 %245, %v139_v10  }
  0x11   :  { %148 = vperm.xlu1 %246, %v140_v11  }
  0x14   :  { %177 = vperm.xlu0 %245, %v173_v12  }
  0x15   :  { %182 = vperm.xlu1 %246, %v174_v13  }
  0x7f   :  { %v43_v14 = vpop.permute.xlu0 %42 }
  0x83   :  { %v48_v19 = vpop.permute.xlu0 %47 }
  0xc5   :  { %v99_v15 = vpop.f32.mrf.mxu0 }
  0xc6   :  { %v100_v16 = vadd.f32 %v99_v15, %v43_v14 }
  0xc7   :  { %v236_v17 = vpop.f32.mrf.mxu0 }
  0xc8   :  { %106 = vst [vmem:[#allocation2] sm:$0xff] %v100_v16  ;;  %v228_v18 = vmul.f32 -1.442695, %v100_v16 }
  0xc9   :  { %v102_v20 = vpop.f32.mrf.mxu0 }
  0xca   :  { %249 = vpow2.f32 %v228_v18  ;;  %v103_v21 = vadd.f32 %v102_v20, %v48_v19 }
  0xcb   :  { %v237_v22 = vpop.f32.mrf.mxu0 }
  0xcc   :  { %107 = vst [vmem:[#allocation2 + $0x8] sm:$0xff] %v103_v21  ;;  %v229_v23 = vmul.f32 -1.442695, %v103_v21 }
  0xcd   :  { %268 = shalt.err (!%p265_p4)
}
  0xce   :  { %s305_s4 = smov 128   ;;  %s306_s30 = smov 8   ;;  %251 = vpow2.f32 %v229_v23  ;;  %v164_v24 = vpop.permute.xlu1 %163  ;;  %v133_v26 = vlaneseq  ;;  %v126_v32 = vpop.permute.xlu0 %125  ;;  %v120_v35 = vld [vmem:[%s416_s7] sm:$0x3] }
  0xcf   :  { %204 = dma.vmem_to_hbm [thread:$0]  %s199_s29, 256, %s417_s8, [#allocation3], %s305_s4, %s305_s4, %s306_s30  }
  0xd0   :  { %v134_v30 = vshrl.u32 %v133_v26, 7  ;;  %s307_s7 = smov [#allocation4]  }
  0xd1   :  { %s210_s8 = sshll.u32 %s307_s7, 4  ;;  %s211_s8 = int_to_ptr.vmem [resolvable:$true] %s210_s8 }
  0xd2   :  { %v169_v29 = vpop.permute.xlu1 %168  ;;  %v135_v33 = vsub.s32 0, %v134_v30  ;;  %v153_v34 = vsub.s32 1, %v134_v30  ;;  %v144_v37 = vpop.permute.xlu0 %143  ;;  %s277_s14 = scalar_lea.vmem %s211_s8, 256  ;;  %p282_p6 = scmp.lt.s32.totalorder %s211_s8, %s211_s8 }
  0xd3   :  { %p278_p5 = scmp.ne.s32.totalorder %s211_s8, %s277_s14  ;;  %p283_p7 = scmp.lt.s32.totalorder %s277_s14, %s277_s14 }
  0xd4   :  { %v136_v38 = vrot.slane %v120_v35, %v135_v33  ;;  %v154_v39 = vrot.slane %v120_v35, %v153_v34 }
  0xd5   :  { %p284_p8 = por %p283_p7, %p282_p6 }
  0xd6   :  { %v131_v36 = vpop.permute.xlu1 %130  ;;  %v137_v42 = vmul.f32 %v136_v38, %v126_v32  ;;  %v155_v43 = vmul.f32 %v154_v39, %v144_v37  ;;  %v178_v45 = vpop.permute.xlu0 %177 }
  0xd7   :  { %v250_v25 = vpop.eup %249  ;;  %v138_v48 = vmul.f32 %v136_v38, %v131_v36  ;;  %p285_p9 = pnand %p284_p8, %p278_p5 }
  0xd8   :  { %v114_v27 = vadd.f32 1.0, %v250_v25  ;;  %v157_v49 = vadd.f32 %v155_v43, %v137_v42 }
  0xda   :  { %253 = vrcp.f32 %v114_v27  ;;  %v149_v41 = vpop.permute.xlu1 %148 }
  0xdb   :  { %v252_v28 = vpop.eup %251  ;;  %v156_v52 = vmul.f32 %v154_v39, %v149_v41 }
  0xdc   :  { %v115_v31 = vadd.f32 1.0, %v252_v28 }
  0xdd   :  { %v158_v56 = vadd.f32 %v156_v52, %v138_v48 }
  0xde   :  { %255 = vrcp.f32 %v115_v31  ;;  %v183_v53 = vpop.permute.xlu1 %182 }
  0xe7   :  { %v254_v40 = vpop.eup %253 }
  0xe8   :  { %v171_v44 = vmul.f32 %v254_v40, %v164_v24 }
  0xea   :  { %v185_v46 = vadd.f32 %v178_v45, %v171_v44 }
  0xeb   :  { %v256_v47 = vpop.eup %255 }
  0xec   :  { %v187_v50 = vmul.f32 %v254_v40, %v185_v46  ;;  %v172_v51 = vmul.f32 %v256_v47, %v169_v29 }
  0xee   :  { %v189_v54 = vadd.f32 %v187_v50, %v157_v49  ;;  %v186_v55 = vadd.f32 %v183_v53, %v172_v51 }
  0xf0   :  { %191 = vst [vmem:[#allocation4] sm:$0xff] %v189_v54  ;;  %v188_v57 = vmul.f32 %v256_v47, %v186_v55 }
  0xf2   :  { %v190_v58 = vadd.f32 %v188_v57, %v158_v56 }
  0xf4   :  { %192 = vst [vmem:[#allocation4 + $0x8] sm:$0xff] %v190_v58 }
  0xf5   :  { %288 = shalt.err (!%p285_p9)
}
  0xf6   :  { %216 = dma.vmem_to_hbm [thread:$0]  %s211_s8, 256, %s418_s9, [#allocation5], %s305_s4, %s305_s4, %s306_s30  }
  0xf7   :  { %297 = dma.done.wait [#allocation3], 256  }
  0xf8   :  { %298 = vsyncadd [#allocation3], 4294967040 }
  0xf9   :  { %299 = dma.done.wait [#allocation5], 256  }
  0xfa   :  { %300 = vsyncadd [#allocation5], 4294967040 }
  0xfb   :  { %223 = vsyncpa [#allocation3], 1 }
  0xfc   :  { %224 = vsyncpa [#allocation5], 1 }

</bundles_post_ra>
